<compile_context>
chip_gen: v6e
topology: v6e:2x2x1
jax: 0.10.0
libtpu: 0.0.40
codegen_flags: <defaults>
</compile_context>

<pallas_src>
import functools

import jax
import jax.numpy as jnp
from jax.experimental import pallas as pl
from jax.experimental.pallas import tpu as pltpu


def _round_up(x, m):
    return ((x + m - 1) // m) * m


def _lane_pad_embed(embed_dim):
    # Pad E to a 128-lane multiple only when the relative inflation is small
    # (E > 128).  For small E, padding would inflate output HBM writes and
    # force an extra slice pass; masked stores of the true width are cheaper.
    if embed_dim % 128 == 0 or embed_dim < 128:
        return embed_dim
    return _round_up(embed_dim, 128)


def _packed_dims(num_channels, patch_size, embed_dim):
    ph, pw = patch_size
    K = num_channels * ph * pw
    Kp = _round_up(K, 128)          # lane-dense LHS, full MXU K passes
    Ep = _lane_pad_embed(embed_dim)
    return K, Kp, Ep


def pack_patch_embed_params(weight, bias, *, compute_dtype=jnp.bfloat16):
    """One-time packing: Conv2d (E,C,ph,pw)/(E,) -> (Kp, Ep) bf16 / (1, Ep) f32.

    Call once (outside the forward / jit) and pass the packed tensors to
    patch_embeddings_forward to avoid a per-call transpose + convert.
    """
    E, C, ph, pw = weight.shape
    K, Kp, Ep = _packed_dims(C, (ph, pw), E)
    # PyTorch Conv2d flattens each kernel as (C, ph, pw) -> K; match that order.
    w_mat = weight.reshape(E, K).T.astype(compute_dtype)     # (K, E)
    b_mat = bias.reshape(1, E).astype(jnp.float32)           # (1, E)
    if Kp != K:
        w_mat = jnp.pad(w_mat, ((0, Kp - K), (0, 0)))        # zero rows: inert
    if Ep != E:
        w_mat = jnp.pad(w_mat, ((0, 0), (0, Ep - E)))
        b_mat = jnp.pad(b_mat, ((0, 0), (0, Ep - E)))
    return w_mat, b_mat


def _patch_embed_kernel(x_ref, w_ref, b_ref, o_ref):
    # x_ref: (TM, Kp) bf16 patch tile; w_ref: (Kp, Ep) bf16; b_ref: (1, Ep) f32.
    acc = jnp.dot(x_ref[...], w_ref[...], preferred_element_type=jnp.float32)
    o_ref[...] = (acc + b_ref[...]).astype(o_ref.dtype)


def patch_embeddings_forward(
    pixel_values,
    weight,
    bias,
    *,
    image_size,
    patch_size,
    embed_dim=None,
    compute_dtype=jnp.bfloat16,
    out_dtype=None,
    tile_m=1024,
):
    """pixel_values: (B, C, H, W).

    weight/bias: either raw Conv2d params (E, C, ph, pw) / (E,), or the
    pre-packed (Kp, Ep) / (1, Ep) tensors from pack_patch_embed_params()
    (pass embed_dim explicitly in that case).
    """
    B, C, H, W = pixel_values.shape
    ph, pw = patch_size
    if H != image_size[0] or W != image_size[1]:
        raise ValueError(
            f"Input image size ({H}*{W}) doesn't match model "
            f"({image_size[0]}*{image_size[1]})."
        )
    if H % ph or W % pw:
        raise ValueError("image_size must be divisible by patch_size.")
    gh, gw = H // ph, W // pw
    num_patches = gh * gw

    if weight.ndim == 4:                       # raw Conv2d params: pack in-line
        E = weight.shape[0]
        w_mat, b_mat = pack_patch_embed_params(weight, bias, compute_dtype=compute_dtype)
    else:                                      # pre-packed params
        if embed_dim is None:
            raise ValueError("embed_dim is required with pre-packed weights.")
        E = int(embed_dim)
        w_mat, b_mat = weight, bias

    K, Kp, Ep = _packed_dims(C, (ph, pw), E)
    assert w_mat.shape == (Kp, Ep), (w_mat.shape, (Kp, Ep))
    assert b_mat.shape == (1, Ep), (b_mat.shape, (1, Ep))

    M = B * num_patches
    out_dtype = pixel_values.dtype if out_dtype is None else out_dtype

    # --- patch extraction (XLA layout glue; see TODO at top) ----------------
    patches = pixel_values.reshape(B, C, gh, ph, gw, pw)
    patches = patches.transpose(0, 2, 4, 1, 3, 5)            # (B, gh, gw, C, ph, pw)
    patches = patches.reshape(M, K).astype(compute_dtype)    # (M, K)
    if Kp != K:
        patches = jnp.pad(patches, ((0, 0), (0, Kp - K)))    # zero cols: inert

    # --- tiling & VMEM budget ------------------------------------------------
    cb = jnp.dtype(compute_dtype).itemsize
    ob = jnp.dtype(out_dtype).itemsize

    try:
        vmem_cap = int(pltpu.get_tpu_info().vmem_capacity_bytes)
    except Exception:
        vmem_cap = 64 << 20            # conservative (v7x per-core VMEM)
    vmem_budget = (vmem_cap * 3) // 4  # leave headroom for Mosaic scratch

    def step_vmem(tm):
        # The pipeliner double-buffers every operand, including the
        # grid-invariant weight/bias (their blocks are not re-DMA'd, but the
        # spare buffer is still allocated), plus headroom.
        return (2 * tm * Kp * cb + 2 * tm * Ep * ob
                + 2 * Kp * Ep * cb + 2 * Ep * 4 + (2 << 20))

    # >= 4 grid steps when M allows (>= 2 per v7x TensorCore) so "parallel"
    # actually shards and the DMA pipeline has something to overlap; TM kept a
    # multiple of 16 (bf16 sublane pack).
    TM = max(16, min(_round_up(int(tile_m), 16), _round_up(pl.cdiv(M, 4), 16)))
    while TM > 16 and step_vmem(TM) > vmem_budget:
        TM = max(16, _round_up(TM // 2, 16))
    grid = (pl.cdiv(M, TM),)
    vmem_limit = int(min(max(step_vmem(TM), 16 << 20), vmem_budget))

    cost = pl.CostEstimate(
        flops=2 * M * K * E,
        transcendentals=0,
        bytes_accessed=M * Kp * cb + Kp * Ep * cb + Ep * 4 + M * Ep * ob,
    )

    out_flat = pl.pallas_call(
        _patch_embed_kernel,
        out_shape=jax.ShapeDtypeStruct((M, Ep), out_dtype),
        grid=grid,
        in_specs=[
            pl.BlockSpec((TM, Kp), lambda i: (i, 0)),   # streamed activation tiles
            pl.BlockSpec((Kp, Ep), lambda i: (0, 0)),   # VMEM-resident weight
            pl.BlockSpec((1, Ep), lambda i: (0, 0)),    # VMEM-resident bias
        ],
        out_specs=pl.BlockSpec((TM, Ep), lambda i: (i, 0)),
        compiler_params=pltpu.CompilerParams(
            dimension_semantics=("parallel",),          # megacore shards M (v7x)
            vmem_limit_bytes=vmem_limit,
            allow_input_fusion=[True, False, False],    # let XLA fuse the im2col if it can
        ),
        cost_estimate=cost,
    )(patches, w_mat, b_mat)

    out = out_flat[:, :E] if Ep != E else out_flat
    return out.reshape(B, num_patches, E)


if __name__ == "__main__":
    # Small shapes consistent with the module:
    #   image_size=16, patch_size=4, num_channels=4, embed_dim=32, batch=2
    image_size = (16, 16)
    patch_size = (4, 4)
    num_channels = 4
    embed_dim = 32
    batch = 2

    key = jax.random.PRNGKey(0)
    k_x, k_w, k_b = jax.random.split(key, 3)

    x = jax.random.normal(
        k_x, (batch, num_channels, image_size[0], image_size[1]), dtype=jnp.float32
    )
    # Conv2d(num_channels, embed_dim, kernel_size=patch_size, stride=patch_size)
    weight = jax.random.normal(
        k_w, (embed_dim, num_channels, patch_size[0], patch_size[1]),
        dtype=jnp.float32,
    ) * 0.02
    bias = jax.random.normal(k_b, (embed_dim,), dtype=jnp.float32) * 0.02

    # One-time weight packing, hoisted out of the forward path (review item).
    w_packed, b_packed = pack_patch_embed_params(weight, bias)

    fwd = jax.jit(functools.partial(
        patch_embeddings_forward,
        image_size=image_size, patch_size=patch_size, embed_dim=embed_dim))
    out = jax.block_until_ready(fwd(x, w_packed, b_packed))

    # Reference check against lax.conv_general_dilated (same semantics as nn.Conv2d),
    # then flatten(2).transpose(1, 2).
    ref = jax.lax.conv_general_dilated(
        x, weight, window_strides=patch_size, padding="VALID",
        dimension_numbers=("NCHW", "OIHW", "NCHW"),
    ) + bias.reshape(1, embed_dim, 1, 1)
    ref = ref.reshape(batch, embed_dim, -1).transpose(0, 2, 1)

    num_patches = (image_size[0] // patch_size[0]) * (image_size[1] // patch_size[1])
    assert out.shape == (batch, num_patches, embed_dim), out.shape
    # bf16 inputs with f32 accumulation: loosened tolerance vs the f32 reference.
    assert jnp.allclose(out, ref, atol=2e-2, rtol=2e-2), float(jnp.max(jnp.abs(out - ref)))

    print("KERNEL_OK")
</pallas_src>

<mosaic_0001>
module attributes {stable_mosaic.version = 11 : i64} {
  func.func @_patch_embed_kernel(%arg0: i32, %arg1: memref<16x128xbf16, #tpu.memory_space<vmem>>, %arg2: memref<128x32xbf16, #tpu.memory_space<vmem>>, %arg3: memref<1x32xf32, #tpu.memory_space<vmem>>, %arg4: memref<16x32xf32, #tpu.memory_space<vmem>>) attributes {dimension_semantics = [#tpu.dimension_semantics<parallel>], iteration_bounds = array<i64: 2>, scalar_prefetch = 0 : i64, scratch_operands = 0 : i64, tpu.core_type = #tpu.core_type<tc>, window_params = [{transform_indices = @transform_0, window_bounds = array<i64: 16, 128>}, {pipeline_mode = #tpu.pipeline_mode<synchronous>, transform_indices = @transform_1, window_bounds = array<i64: 128, 32>}, {pipeline_mode = #tpu.pipeline_mode<synchronous>, transform_indices = @transform_2, window_bounds = array<i64: 1, 32>}, {transform_indices = @transform_3, window_bounds = array<i64: 16, 32>}]} {
    %c0 = arith.constant 0 : index
    %c0_0 = arith.constant 0 : index
    %0 = vector.load %arg1[%c0, %c0_0] : memref<16x128xbf16, #tpu.memory_space<vmem>>, vector<16x128xbf16>
    %c0_1 = arith.constant 0 : index
    %c0_2 = arith.constant 0 : index
    %1 = vector.load %arg2[%c0_1, %c0_2] : memref<128x32xbf16, #tpu.memory_space<vmem>>, vector<128x32xbf16>
    %cst = arith.constant dense<0.000000e+00> : vector<16x32xf32>
    %2 = tpu.matmul %0, %1, %cst {dimension_numbers = #tpu.dot_dimension_numbers<[1], [0], [0], [1], [0, 0, 1, 1], [], []>} : vector<16x128xbf16>, vector<128x32xbf16>, vector<16x32xf32> -> vector<16x32xf32>
    %c0_3 = arith.constant 0 : index
    %c0_4 = arith.constant 0 : index
    %3 = vector.load %arg3[%c0_3, %c0_4] : memref<1x32xf32, #tpu.memory_space<vmem>>, vector<1x32xf32>
    %4 = vector.broadcast %3 : vector<1x32xf32> to vector<16x32xf32>
    %5 = arith.addf %2, %4 : vector<16x32xf32>
    %c0_5 = arith.constant 0 : index
    %c0_6 = arith.constant 0 : index
    %6 = vector.load %arg4[%c0_5, %c0_6] : memref<16x32xf32, #tpu.memory_space<vmem>>, vector<16x32xf32>
    tpu.vector_store %arg4[%c0_5, %c0_6], %5 {strides = array<i32>} : memref<16x32xf32, #tpu.memory_space<vmem>>, vector<16x32xf32>,
    return
  }
  func.func @transform_0(%arg0: i32) -> (i32, i32) {
    %c0_i32 = arith.constant 0 : i32
    %c0_i32_0 = arith.constant 0 : i32
    return %arg0, %c0_i32 : i32, i32
  }
  func.func @transform_1(%arg0: i32) -> (i32, i32) {
    %c0_i32 = arith.constant 0 : i32
    %c0_i32_0 = arith.constant 0 : i32
    %c0_i32_1 = arith.constant 0 : i32
    return %c0_i32, %c0_i32_0 : i32, i32
  }
  func.func @transform_2(%arg0: i32) -> (i32, i32) {
    %c0_i32 = arith.constant 0 : i32
    %c0_i32_0 = arith.constant 0 : i32
    %c0_i32_1 = arith.constant 0 : i32
    return %c0_i32, %c0_i32_0 : i32, i32
  }
  func.func @transform_3(%arg0: i32) -> (i32, i32) {
    %c0_i32 = arith.constant 0 : i32
    %c0_i32_0 = arith.constant 0 : i32
    return %arg0, %c0_i32 : i32, i32
  }
}

</mosaic_0001>

<bundles_post_ra>
// kernel: patch_embeddings_forward.2
= control target key start
LH: loop header
LB: loop body
LE: loop exit
PB: predicated region body
PF: predicated region fallthrough
CT: control target
= control target key end

     0   :  { %s754_s0 = inlined_call_operand.vmem [shape: bf16[128,32], index: 0, kind: input, shape index: {}]   ;;  %s755_s1 = inlined_call_operand.vmem [shape: f32[1,32], index: 1, kind: input, shape index: {}]   ;;  %s756_s2 = inlined_call_operand.vmem [shape: bf16[32,64], index: 2, kind: input, shape index: {}]   ;;  %s757_s3 = inlined_call_operand.<no memory space> [shape: bf16[], index: 3, kind: input, shape index: {}]   ;;  %s758_s4 = inlined_call_operand.hbm [shape: f32[32,32], index: 4, kind: output, shape index: {}]  }
   0x1   :  { %v9_v0 = vstv %s757_s3 }
   0x2   :  { %v622_v1 = vunpack.i.l.bf16 %v9_v0 }
   0x3   :  { %14 = vsyncpa [#allocation8], 0 }
   0x4   :  { %16 = vsyncpa [#allocation8 + $0x1], 0  ;;  %s624_s17 = smov 0   ;;  %s626_s18 = smov 0  }
   0x5   :  { %s628_s19 = smov 0   ;;  %s630_s20 = smov 0  }
   0x6 LB: > { %s645_s3 = sadd.s32 4294967295, %s587_s20   ;;  %s422_s21 = sadd.s32 4294967294, %s587_s20   ;;  %s587_s20 = sphi %s630_s20, %s764_s20   ;;  %s583_s19 = sphi %s628_s19, %s763_s19   ;;  %s579_s18 = sphi %s626_s18, %s762_s18   ;;  %s575_s17 = sphi %s624_s17, %s761_s17  }
   0x7   : > { %s649_s22 = sadd.s32 1, %s587_s20   ;;  %s97_s23 = sadd.s32 1, %s583_s19 }
   0x8   : > { %s94_s24 = ssub.s32 %s587_s20, %s649_s22  ;;  %p107_p0 = scmp.ne.s32.totalorder %s583_s19, %s579_s18 }
   0x9   : > { %p95_p1 = scmp.eq.s32.totalorder %s94_s24, 0  ;;  %p108_p2 = scmp.eq.s32.totalorder %s645_s3, 1 }
   0xa   : > { %p113_p3 = scmp.ne.s32.totalorder %s579_s18, %s575_s17  ;;  %p114_p4 = scmp.eq.s32.totalorder %s422_s21, 1 }
   0xb   : > { %s660_s25 = scalar_select %p95_p1, %s583_s19, %s97_s23  }
   0xc   : > { %p662_p5 = por %p108_p2, %p107_p0  ;;  %p666_p6 = por %p114_p4, %p113_p3 }
   0xd   : > { %p425_p7 = scmp.ge.s32.totalorder %s587_s20, 1  ;;  %p147_p8 = scmp.lt.s32.totalorder %s587_s20, 3 }
   0xf   : > { %p148_p9 = pnand %p425_p7, %p147_p8 }
  0x11   : > { %151 = sbr.rel (%p148_p9) target bundleno = 268 (0x10c), region = 32 }
  0x16   : > { %v518_v2 = vld [vmem:[%s754_s0 + $0x38] sm:$0xff]   ;;  %v589_v3 = vmov 0.0   ;;  %v190_v4 = vlaneseq  ;;  %v519_v5 = vld [vmem:[%s754_s0 + $0x30] sm:$0xff]   ;;  %vm590_vm0 = vmmov 0   ;;  %s427_s6 = sshll.u32 %s645_s3, 1  ;;  %v520_v7 = vld [vmem:[%s754_s0 + $0x28] sm:$0xff]  }
  0x17   : > { %455 = vmatprep.subr.bf16.mxu0 %v589_v3  ;;  %471 = vmatprep.mubr.msk.bf16.mxu0 %vm590_vm0, %v589_v3  ;;  %p172_p10 = scmp.lt.s32.totalorder %s427_s6, 3  ;;  %v521_v9 = vld [vmem:[%s754_s0 + $0x20] sm:$0xff]   ;;  %v522_v16 = vld [vmem:[%s754_s0 + $0x18] sm:$0xff]   ;;  %v523_v17 = vld [vmem:[%s754_s0 + $0x10] sm:$0xff]   ;;  %s168_s5 = sand.u32 1, %s579_s18   ;;  %vm343_vm2 = vcmask 261120  }
  0x18   : > { %456 = vmatpush3.bf16.msra.mxu0 %v518_v2  ;;  %v191_v6 = vand.u32 127, %v190_v4  ;;  %v524_v18 = vld [vmem:[%s754_s0 + $0x8] sm:$0xff]   ;;  %v525_v19 = vld [vmem:[%s754_s0] sm:$0xff]   ;;  %s445_s11 = sshll.u32 %s645_s3, 8  ;;  %s714_s15 = scalar_lea.sflag [#allocation8], %s168_s5 }
  0x19   : > { %457 = vmatprep.subr.bf16.mxu0 %v589_v3  ;;  %s766_s6 = smov (!%p172_p10, %s427_s6), 3  ;;  %v430_v21 = vld [vmem:[%s755_s1] ss:$0 sm:$0xff]  ;;  %s712_s14 = scalar_lea.hbm %s758_s4, %s445_s11 }
  0x1a   : > { %s428_s9 = sshll.u32 %s766_s6, 2  ;;  %vm193_vm1 = vcmp.lt.s32.totalorder %v191_v6, 64  ;;  %s426_s6 = sshll.u32 %s168_s5, 4 }
  0x1b   : > { %s175_s12 = scalar_lea.vmem %s756_s2, %s428_s9  ;;  %s170_s9 = scalar_lea.vmem [#allocation7], %s426_s6 }
  0x1c   : > { %458 = vmatpush3.bf16.msra.mxu0 %v519_v5  ;;  %v187_v8 = vld [vmem:[%s175_s12] sm:$0xff]   ;;  %s360_s10 = sshll.u32 %s170_s9, 4  ;;  %s591_s3 = smov [#allocation7]   ;;  %s707_s10 = int_to_ptr.vmem [resolvable:$true] %s360_s10 }
  0x1d   : > { %459 = vmatprep.subr.bf16.mxu0 %v589_v3  ;;  %v188_v10 = vunpack.c.l.bf16 %v187_v8  ;;  %v210_v11 = vunpack.c.h.bf16 %v187_v8  ;;  %s527_s16 = scalar_lea.vmem %s707_s10, 256  ;;  %s531_s21 = sshll.u32 %s591_s3, 4  ;;  %s532_s21 = int_to_ptr.vmem [resolvable:$false] %s531_s21 }
  0x1e   : > { %p528_p11 = scmp.ne.s32.totalorder %s707_s10, %s527_s16  ;;  %s533_s23 = scalar_lea.vmem %s532_s21, 512 }
  0x1f   : > { %v194_v12 = vsel %vm193_vm1, %v188_v10, %v622_v1  ;;  %v216_v13 = vsel %vm193_vm1, %v210_v11, %v622_v1  ;;  %p534_p0 = scmp.lt.s32.totalorder %s707_s10, %s532_s21  ;;  %p535_p1 = scmp.lt.s32.totalorder %s533_s23, %s527_s16 }
  0x20   : > { %460 = vmatpush3.bf16.msra.mxu0 %v520_v7  ;;  %v195_v14 = vpack.c.bf16 %v589_v3, %v194_v12  ;;  %v218_v15 = vpack.c.bf16 %v589_v3, %v216_v13  ;;  %p529_p12 = pnand %p528_p11, %p662_p5 }
  0x21   : > { %461 = vmatprep.subr.bf16.mxu0 %v589_v3  ;;  %p536_p2 = por %p535_p1, %p534_p0 }
  0x22   : > { %198 = vst [vmem:[#allocation9] sm:$0xf] %v195_v14  ;;  %221 = vst [vmem:[#allocation9 + $0x4] sm:$0xf] %v218_v15  ;;  %p530_p13 = pneg %p529_p12 }
  0x24   : > { %462 = vmatpush3.bf16.msra.mxu0 %v521_v9  ;;  %p537_p3 = pnand %p536_p2, %p530_p13 }
  0x25   : > { %463 = vmatprep.subr.bf16.mxu0 %v589_v3 }
  0x28   : > { %464 = vmatpush3.bf16.msra.mxu0 %v522_v16 }
  0x29   : > { %465 = vmatprep.subr.bf16.mxu0 %v589_v3  ;;  %v526_v20 = vld [vmem:[#allocation9] sm:$0xff]  }
  0x2c   : > { %466 = vmatpush3.bf16.msra.mxu0 %v523_v17 }
  0x2d   : > { %467 = vmatprep.subr.bf16.mxu0 %v589_v3 }
  0x30   : > { %468 = vmatpush3.bf16.msra.mxu0 %v524_v18 }
  0x31   : > { %469 = vmatprep.subr.bf16.mxu0 %v589_v3 }
  0x34   : > { %470 = vmatpush3.bf16.msra.mxu0 %v525_v19 }
  0x37   : > { %472 = vmatmul.mubr.bf16.vlgmr.msra.gmra.mxu0 %v526_v20 }
  0xf7   : > { %v336_v22 = vpop.f32.mrf.mxu0 }
  0xf8   : > { %v337_v23 = vadd.f32 %v430_v21, %v336_v22 }
  0xf9   : > { %v473_v24 = vpop.f32.mrf.mxu0 }
  0xfa   : > { %344 = vst.msk [vmem:[%s170_s9] sm:$0xff] %vm343_vm2, %v337_v23 }
  0xfb   : > { %v339_v25 = vpop.f32.mrf.mxu0 }
  0xfc   : > { %v340_v26 = vadd.f32 %v430_v21, %v339_v25 }
  0xfd   : > { %v474_v27 = vpop.f32.mrf.mxu0 }
  0xfe   : > { %345 = vst.msk [vmem:[%s170_s9 + $0x8] sm:$0xff] %vm343_vm2, %v340_v26 }
  0xff   : > { %540 = shalt.err (!%p537_p3)
}
 0x100   : > { %s541_s24 = scalar_lea.hbm %s712_s14, 256  ;;  %s545_s30 = scalar_lea.hbm %s758_s4, 512 }
 0x101   : > { %p542_p4 = scmp.ne.s32.totalorder %s712_s14, %s541_s24  ;;  %p546_p9 = scmp.lt.s32.totalorder %s712_s14, %s758_s4 }
 0x102   : > { %p547_p10 = scmp.lt.s32.totalorder %s545_s30, %s541_s24 }
 0x103   : > { %p543_p7 = pnand %p542_p4, %p662_p5 }
 0x104   : > { %p548_p11 = por %p547_p10, %p546_p9 }
 0x105   : > { %p544_p8 = pneg %p543_p7 }
 0x107   : > { %p549_p12 = pnand %p548_p11, %p544_p8 }
 0x109   : > { %552 = shalt.err (!%p549_p12)
}
 0x10a   : > { %s592_s7 = smov 128   ;;  %s593_s8 = smov 8  }
 0x10b   : > { %475 = dma.vmem_to_hbm [thread:$0]  (%p662_p5), %s707_s10, 256, %s712_s14, %s714_s15, %s592_s7, %s592_s7, %s593_s8  }
 0x10c PF: > { %p481_p13 = scmp.ge.s32.totalorder %s587_s20, 2  ;;  %s375_s9 = sand.u32 1, %s575_s17  }
 0x10d   : > { %s376_s11 = scalar_lea.sflag [#allocation8], %s375_s9 }
 0x10e   : > { %p478_p0 = pnand %p481_p13, %p666_p6 }
 0x110   : > { %p479_p1 = pneg %p478_p0 }
 0x112   : > { %570 = dma.done.wait (%p479_p1), %s376_s11, 256  }
 0x113   : > { %572 = vsyncadd (%p479_p1), %s376_s11, 4294967040  ;;  %p19_p2 = scmp.ge.s32.totalorder %s649_s22, 4   ;;  %s761_s17 = smov %s579_s18 }
 0x114   : > { %s762_s18 = smov %s583_s19  ;;  %s763_s19 = smov %s660_s25 }
 0x115   : > { %s764_s20 = smov %s649_s22  ;;  %21 = sbr.rel (!%p19_p2) target bundleno = 6 (0x6), region = 69 }
 0x11a   :  { %381 = vsyncpa [#allocation8], 1 }
 0x11b   :  { %383 = vsyncpa [#allocation8 + $0x1], 1 }

</bundles_post_ra>
